<compile_context>
chip_gen: v7x
topology: tpu7x:2x2x1
jax: 0.10.0
libtpu: 0.0.40
codegen_flags: <defaults>
</compile_context>

<pallas_src>
import functools

import jax
import jax.numpy as jnp
from jax.experimental import pallas as pl
from jax.experimental.pallas import tpu as pltpu


def _cdiv(a, b):
    return -(-a // b)


def _round_up(x, m):
    return _cdiv(x, m) * m


def _ce_kernel(*refs, prob_tgt, n_tgts, n_rows):
    """One grid step: partial CE sums (one per prob input) + valid-row counts
    (one per target).  Every step owns its own (1,1,K) output blocks -> no
    cross-step accumulation or init; the row axis is embarrassingly parallel."""
    n_probs = len(prob_tgt)
    tgt_refs = refs[:n_tgts]
    prob_refs = refs[n_tgts:n_tgts + n_probs]
    sum_ref = refs[n_tgts + n_probs]        # (1, 1, n_probs) float32
    cnt_ref = refs[n_tgts + n_probs + 1]    # (1, 1, n_tgts)  int32

    i = pl.program_id(0)
    tm, c = prob_refs[0].shape

    # Row mask: the last tile may be partial; its tail rows hold garbage.
    row = jax.lax.broadcasted_iota(jnp.int32, (tm, 1), 0) + i * tm
    in_range = row < n_rows
    lane = jax.lax.broadcasted_iota(jnp.int32, (tm, c), 1)

    # Per-target valid mask / one-hot match mask / valid count (shared by all
    # prob inputs using the same target -> computed once per step).
    valids, matches = [], []
    cnt_pos = jax.lax.broadcasted_iota(jnp.int32, (1, 1, n_tgts), 2)
    cnts = jnp.zeros((1, 1, n_tgts), jnp.int32)
    for t in range(n_tgts):
        tgt = tgt_refs[t][...]                                # (tm, 1) int32
        v = in_range & (tgt != -1)
        valids.append(v)
        matches.append(lane == tgt)
        c_t = jnp.sum(v.astype(jnp.int32), axis=0, keepdims=True)   # (1, 1)
        cnts = cnts + jnp.where(cnt_pos == t, c_t.reshape(1, 1, 1), 0)
    cnt_ref[...] = cnts

    sum_pos = jax.lax.broadcasted_iota(jnp.int32, (1, 1, n_probs), 2)
    sums = jnp.zeros((1, 1, n_probs), jnp.float32)
    for k in range(n_probs):
        t = prob_tgt[k]
        p = prob_refs[k][...].astype(jnp.float32)             # (tm, C)
        # gather p[row, tgt[row]] via masked lane-sum (exactly one lane matches
        # a valid target; zero matches -> p_t = 0 -> +inf loss, masked away).
        p_t = jnp.sum(jnp.where(matches[t], p, 0.0), axis=-1, keepdims=True)
        p_sum = jnp.sum(p, axis=-1, keepdims=True)
        # CrossEntropyLoss on log(p):
        #   logsumexp(log p) - log p[tgt]  ==  log(sum_c p) - log(p[tgt])
        loss = jnp.where(valids[t], jnp.log(p_sum) - jnp.log(p_t), 0.0)
        s_k = jnp.sum(loss, axis=0, keepdims=True)            # (1, 1)
        sums = sums + jnp.where(sum_pos == k, s_k.reshape(1, 1, 1), 0.0)
    sum_ref[...] = sums


def _ce_mean_fused(probs_list, targets_list, prob_tgt):
    """probs_list[k]: (M, C) probabilities.  targets_list[t]: (M,) int32 with
    -1 marking ignored rows.  prob_tgt[k] maps prob k -> its target index.
    Returns [mean CE over valid rows for each prob] (NaN if zero valid rows,
    matching PyTorch's 'mean' reduction with ignore_index)."""
    M, C = probs_list[0].shape
    for p in probs_list:
        assert p.shape == (M, C), "fused prob inputs must share a shape"
    n_probs = len(probs_list)
    n_tgts = len(targets_list)
    assert len(prob_tgt) == n_probs and max(prob_tgt) < n_tgts

    itemsizes = [jnp.dtype(p.dtype).itemsize for p in probs_list]
    # Native sublane multiple of the narrowest prob dtype keeps DMA and vreg
    # packing relayout-free (8 for f32, 16 for bf16, 32 for int8/fp8).
    sub = max(8, 32 // min(itemsizes))

    # Per-row VMEM bytes: double-buffered prob blocks + double-buffered
    # lane-padded (tm,1) target blocks + in-kernel temporaries (f32 upcast,
    # lane iota, one intermediate), all at lane-padded C.
    c_pad = _round_up(C, 128)
    row_bytes = (sum(2 * c_pad * it for it in itemsizes)
                 + 2 * n_tgts * 128 * 4
                 + 3 * c_pad * 4)

    # Generation-aware budget: 128 MiB-VMEM parts (v5e/v6e) get a large budget;
    # the 64 MiB part (v7x) keeps headroom for compiler scratch / temporaries.
    try:
        vmem_cap = int(getattr(pltpu.get_tpu_info(), "vmem_capacity_bytes",
                               64 << 20))
    except Exception:  # conservative fallback if the query is unavailable
        vmem_cap = 64 << 20
    if vmem_cap >= (128 << 20):
        budget, limit_cap = 80 << 20, 100 << 20
    else:
        budget, limit_cap = 40 << 20, 56 << 20

    tm = budget // row_bytes
    tm = max(sub, min(4096, (tm // sub) * sub))
    tm = min(tm, max(sub, _round_up(M, sub)))     # never exceed the row count
    # Megacore balance: aim for >= 8 grid steps so both v7x TCs stay busy.
    if _cdiv(M, tm) < 8:
        tm = max(sub, min(tm, _round_up(_cdiv(M, 8), sub)))
    n_blocks = _cdiv(M, tm)

    vmem_bytes = int(tm * row_bytes + (8 << 20))
    vmem_bytes = int(min(max(vmem_bytes, 16 << 20), limit_cap))

    kernel = functools.partial(_ce_kernel, prob_tgt=tuple(prob_tgt),
                               n_tgts=n_tgts, n_rows=M)
    tgt_cols = [t.astype(jnp.int32).reshape(M, 1) for t in targets_list]

    sums, cnts = pl.pallas_call(
        kernel,
        out_shape=(jax.ShapeDtypeStruct((n_blocks, 1, n_probs), jnp.float32),
                   jax.ShapeDtypeStruct((n_blocks, 1, n_tgts), jnp.int32)),
        grid_spec=pltpu.PrefetchScalarGridSpec(
            num_scalar_prefetch=0,
            grid=(n_blocks,),
            in_specs=([pl.BlockSpec((tm, 1), lambda i: (i, 0))
                       for _ in range(n_tgts)]
                      + [pl.BlockSpec((tm, C), lambda i: (i, 0))
                         for _ in range(n_probs)]),
            out_specs=(pl.BlockSpec((1, 1, n_probs), lambda i: (i, 0, 0)),
                       pl.BlockSpec((1, 1, n_tgts), lambda i: (i, 0, 0))),
        ),
        compiler_params=pltpu.CompilerParams(
            dimension_semantics=("parallel",),
            vmem_limit_bytes=vmem_bytes),
    )(*tgt_cols, *probs_list)

    total_sum = jnp.sum(sums, axis=(0, 1))                      # (n_probs,)
    total_cnt = jnp.sum(cnts, axis=(0, 1)).astype(jnp.float32)  # (n_tgts,)
    return [total_sum[k] / total_cnt[prob_tgt[k]] for k in range(n_probs)]


def _aligned_targets(target, out_seq, ignore_index, shift):
    """Per-output-row targets.  Rows the PyTorch code slices away (the
    output[:, :-1, :] shift and target[:, :249]) are filled with -1, and any
    user ignore_index value is normalized to -1, so the kernel compares
    against a single sentinel.  Only the tiny integer target tensor is
    touched — the logits are never copied."""
    n = target.shape[0]
    t = jnp.full((n, out_seq), -1, dtype=jnp.int32)
    if shift:
        valid_len = min(out_seq - 1, target.shape[1] - 1, 249)
        src = target[:, 1:1 + valid_len]
    else:
        valid_len = min(out_seq, target.shape[1], 249)
        src = target[:, :valid_len]
    if valid_len > 0:
        src = src.astype(jnp.int32)
        src = jnp.where(src == ignore_index, -1, src)
        t = t.at[:, :valid_len].set(src)
    return t.reshape(-1)


def _ce_loss_single(output, target, ignore_index, shift):
    n, s, c = output.shape
    tgt = _aligned_targets(target, s, ignore_index, shift=shift)
    return _ce_mean_fused([output.reshape(n * s, c)], [tgt], prob_tgt=(0,))[0]


def ce_loss_total_eval(outputs, targets, ignore_index=-1):
    """CELossTotalEval.forward.  Per the PyTorch constructor, the shifted loss
    uses the user ignore_index; the two plain CELoss terms use the default -1."""
    out0, out1, out2 = outputs
    tgt0, tgt1 = targets

    if out0.shape == out1.shape == out2.shape:
        # Fully fused: 3 prob streams + 2 target columns, one pipeline pass.
        n, s, c = out0.shape
        m = n * s
        t_shift = _aligned_targets(tgt0, s, ignore_index, shift=True)
        t_plain = _aligned_targets(tgt1, s, -1, shift=False)
        l0, l1, l2 = _ce_mean_fused(
            [out0.reshape(m, c), out1.reshape(m, c), out2.reshape(m, c)],
            [t_shift, t_plain], prob_tgt=(0, 1, 1))
    else:
        l0 = _ce_loss_single(out0, tgt0, ignore_index, shift=True)
        if out1.shape == out2.shape:
            n, s, c = out1.shape
            t_plain = _aligned_targets(tgt1, s, -1, shift=False)
            l1, l2 = _ce_mean_fused(
                [out1.reshape(n * s, c), out2.reshape(n * s, c)],
                [t_plain], prob_tgt=(0, 0))
        else:
            l1 = _ce_loss_single(out1, tgt1, -1, shift=False)
            l2 = _ce_loss_single(out2, tgt1, -1, shift=False)
    return l0 + l1 + l2


if __name__ == "__main__":
    key = jax.random.PRNGKey(0)
    N, S, C = 2, 8, 32
    k0, k1, k2, k3, k4 = jax.random.split(key, 5)

    # the module consumes probabilities (it applies torch.log itself)
    out0 = jax.nn.softmax(jax.random.normal(k0, (N, S, C)), axis=-1)
    out1 = jax.nn.softmax(jax.random.normal(k1, (N, S, C)), axis=-1)
    out2 = jax.nn.softmax(jax.random.normal(k2, (N, S, C)), axis=-1)

    tgt0 = jax.random.randint(k3, (N, S), 0, C, dtype=jnp.int32)
    tgt1 = jax.random.randint(k4, (N, S), 0, C, dtype=jnp.int32)
    # sprinkle a few ignore_index entries to exercise masking
    tgt0 = tgt0.at[0, 3].set(-1)
    tgt1 = tgt1.at[1, 5].set(-1)

    loss = ce_loss_total_eval((out0, out1, out2), (tgt0, tgt1))
    jax.block_until_ready(loss)

    # pure-JAX reference check (literal translation of the PyTorch module)
    def ref_ce(out, tgt):
        tgt = tgt[:, :249]
        x = jnp.log(out).reshape(-1, out.shape[-1])
        t = tgt.reshape(-1)
        lse = jax.scipy.special.logsumexp(x, axis=-1)
        x_t = jnp.take_along_axis(x, jnp.clip(t, 0)[:, None], axis=-1)[:, 0]
        valid = t != -1
        return jnp.sum(jnp.where(valid, lse - x_t, 0.0)) / jnp.sum(valid)

    ref = (ref_ce(out0[:, :-1, :], tgt0[:, 1:]) + ref_ce(out1, tgt1)
           + ref_ce(out2, tgt1))
    assert jnp.allclose(loss, ref, rtol=1e-5, atol=1e-5), (loss, ref)

    print("KERNEL_OK")
</pallas_src>

<mosaic_0001>
module attributes {stable_mosaic.version = 11 : i64} {
  func.func @_ce_kernel(%arg0: i32, %arg1: memref<8x1xi32, #tpu.memory_space<vmem>>, %arg2: memref<8x1xi32, #tpu.memory_space<vmem>>, %arg3: memref<8x32xf32, #tpu.memory_space<vmem>>, %arg4: memref<8x32xf32, #tpu.memory_space<vmem>>, %arg5: memref<8x32xf32, #tpu.memory_space<vmem>>, %arg6: memref<1x1x3xf32, #tpu.memory_space<vmem>>, %arg7: memref<1x1x2xi32, #tpu.memory_space<vmem>>) attributes {dimension_semantics = [#tpu.dimension_semantics<parallel>], iteration_bounds = array<i64: 2>, scalar_prefetch = 0 : i64, scratch_operands = 0 : i64, tpu.core_type = #tpu.core_type<tc>, window_params = [{transform_indices = @transform_0, window_bounds = array<i64: 8, 1>}, {transform_indices = @transform_1, window_bounds = array<i64: 8, 1>}, {transform_indices = @transform_2, window_bounds = array<i64: 8, 32>}, {transform_indices = @transform_3, window_bounds = array<i64: 8, 32>}, {transform_indices = @transform_4, window_bounds = array<i64: 8, 32>}, {transform_indices = @transform_5, window_bounds = array<i64: 1, 1, 3>}, {transform_indices = @transform_6, window_bounds = array<i64: 1, 1, 2>}]} {
    %0 = tpu.iota {dimensions = array<i32: 0>} : vector<8x1xi32>
    %c8_i32 = arith.constant 8 : i32
    %1 = arith.muli %arg0, %c8_i32 : i32
    %2 = vector.broadcast %1 : i32 to vector<8x1xi32>
    %3 = arith.addi %0, %2 : vector<8x1xi32>
    %c16_i32 = arith.constant 16 : i32
    %4 = vector.broadcast %c16_i32 : i32 to vector<8x1xi32>
    %5 = arith.cmpi slt, %3, %4 : vector<8x1xi32>
    %6 = tpu.iota {dimensions = array<i32: 1>} : vector<8x32xi32>
    %7 = tpu.iota {dimensions = array<i32: 2>} : vector<1x1x2xi32>
    %c0_i32 = arith.constant 0 : i32
    %8 = vector.broadcast %c0_i32 : i32 to vector<1x1x2xi32>
    %c0 = arith.constant 0 : index
    %c0_0 = arith.constant 0 : index
    %9 = vector.load %arg1[%c0, %c0_0] : memref<8x1xi32, #tpu.memory_space<vmem>>, vector<8x1xi32>
    %c-1_i32 = arith.constant -1 : i32
    %10 = vector.broadcast %c-1_i32 : i32 to vector<8x1xi32>
    %11 = arith.cmpi ne, %9, %10 : vector<8x1xi32>
    %12 = arith.andi %5, %11 : vector<8x1xi1>
    %13 = vector.broadcast %9 : vector<8x1xi32> to vector<8x32xi32>
    %14 = arith.cmpi eq, %6, %13 : vector<8x32xi32>
    %15 = arith.extui %12 : vector<8x1xi1> to vector<8x1xi32>
    %cst = arith.constant dense<0> : vector<1xi32>
    %16 = vector.multi_reduction <add>, %15, %cst [0] : vector<8x1xi32> to vector<1xi32>
    %17 = vector.shape_cast %16 : vector<1xi32> to vector<1x1xi32>
    %c0_i32_1 = arith.constant 0 : i32
    %18 = vector.broadcast %c0_i32_1 : i32 to vector<1x1x2xi32>
    %19 = arith.cmpi eq, %7, %18 : vector<1x1x2xi32>
    %20 = vector.shape_cast %17 : vector<1x1xi32> to vector<1x1x1xi32>
    %c0_i32_2 = arith.constant 0 : i32
    %21 = vector.shape_cast %20 : vector<1x1x1xi32> to vector<1x1x1xi32>
    %22 = vector.broadcast %21 : vector<1x1x1xi32> to vector<1x1x2xi32>
    %23 = vector.broadcast %c0_i32_2 : i32 to vector<1x1x2xi32>
    %24 = arith.select %19, %22, %23 : vector<1x1x2xi1>, vector<1x1x2xi32>
    %25 = arith.addi %8, %24 : vector<1x1x2xi32>
    %c0_3 = arith.constant 0 : index
    %c0_4 = arith.constant 0 : index
    %26 = vector.load %arg2[%c0_3, %c0_4] : memref<8x1xi32, #tpu.memory_space<vmem>>, vector<8x1xi32>
    %c-1_i32_5 = arith.constant -1 : i32
    %27 = vector.broadcast %c-1_i32_5 : i32 to vector<8x1xi32>
    %28 = arith.cmpi ne, %26, %27 : vector<8x1xi32>
    %29 = arith.andi %5, %28 : vector<8x1xi1>
    %30 = vector.broadcast %26 : vector<8x1xi32> to vector<8x32xi32>
    %31 = arith.cmpi eq, %6, %30 : vector<8x32xi32>
    %32 = arith.extui %29 : vector<8x1xi1> to vector<8x1xi32>
    %cst_6 = arith.constant dense<0> : vector<1xi32>
    %33 = vector.multi_reduction <add>, %32, %cst_6 [0] : vector<8x1xi32> to vector<1xi32>
    %34 = vector.shape_cast %33 : vector<1xi32> to vector<1x1xi32>
    %c1_i32 = arith.constant 1 : i32
    %35 = vector.broadcast %c1_i32 : i32 to vector<1x1x2xi32>
    %36 = arith.cmpi eq, %7, %35 : vector<1x1x2xi32>
    %37 = vector.shape_cast %34 : vector<1x1xi32> to vector<1x1x1xi32>
    %c0_i32_7 = arith.constant 0 : i32
    %38 = vector.shape_cast %37 : vector<1x1x1xi32> to vector<1x1x1xi32>
    %39 = vector.broadcast %38 : vector<1x1x1xi32> to vector<1x1x2xi32>
    %40 = vector.broadcast %c0_i32_7 : i32 to vector<1x1x2xi32>
    %41 = arith.select %36, %39, %40 : vector<1x1x2xi1>, vector<1x1x2xi32>
    %42 = arith.addi %25, %41 : vector<1x1x2xi32>
    %c0_8 = arith.constant 0 : index
    %c0_9 = arith.constant 0 : index
    %c0_10 = arith.constant 0 : index
    %43 = vector.load %arg7[%c0_8, %c0_9, %c0_10] : memref<1x1x2xi32, #tpu.memory_space<vmem>>, vector<1x1x2xi32>
    tpu.vector_store %arg7[%c0_8, %c0_9, %c0_10], %42 {strides = array<i32>} : memref<1x1x2xi32, #tpu.memory_space<vmem>>, vector<1x1x2xi32>,
    %44 = tpu.iota {dimensions = array<i32: 2>} : vector<1x1x3xi32>
    %cst_11 = arith.constant 0.000000e+00 : f32
    %45 = vector.broadcast %cst_11 : f32 to vector<1x1x3xf32>
    %c0_12 = arith.constant 0 : index
    %c0_13 = arith.constant 0 : index
    %46 = vector.load %arg3[%c0_12, %c0_13] : memref<8x32xf32, #tpu.memory_space<vmem>>, vector<8x32xf32>
    %cst_14 = arith.constant 0.000000e+00 : f32
    %47 = vector.broadcast %cst_14 : f32 to vector<8x32xf32>
    %48 = arith.select %14, %46, %47 : vector<8x32xi1>, vector<8x32xf32>
    %cst_15 = arith.constant dense<0.000000e+00> : vector<8xf32>
    %49 = vector.multi_reduction <add>, %48, %cst_15 [1] : vector<8x32xf32> to vector<8xf32>
    %50 = vector.shape_cast %49 : vector<8xf32> to vector<8x1xf32>
    %cst_16 = arith.constant dense<0.000000e+00> : vector<8xf32>
    %51 = vector.multi_reduction <add>, %46, %cst_16 [1] : vector<8x32xf32> to vector<8xf32>
    %52 = vector.shape_cast %51 : vector<8xf32> to vector<8x1xf32>
    %53 = math.log %52 : vector<8x1xf32>
    %54 = math.log %50 : vector<8x1xf32>
    %55 = arith.subf %53, %54 : vector<8x1xf32>
    %cst_17 = arith.constant 0.000000e+00 : f32
    %56 = vector.broadcast %cst_17 : f32 to vector<8x1xf32>
    %57 = arith.select %12, %55, %56 : vector<8x1xi1>, vector<8x1xf32>
    %cst_18 = arith.constant dense<0.000000e+00> : vector<1xf32>
    %58 = vector.multi_reduction <add>, %57, %cst_18 [0] : vector<8x1xf32> to vector<1xf32>
    %59 = vector.shape_cast %58 : vector<1xf32> to vector<1x1xf32>
    %c0_i32_19 = arith.constant 0 : i32
    %60 = vector.broadcast %c0_i32_19 : i32 to vector<1x1x3xi32>
    %61 = arith.cmpi eq, %44, %60 : vector<1x1x3xi32>
    %62 = vector.shape_cast %59 : vector<1x1xf32> to vector<1x1x1xf32>
    %cst_20 = arith.constant 0.000000e+00 : f32
    %63 = vector.shape_cast %62 : vector<1x1x1xf32> to vector<1x1x1xf32>
    %64 = vector.broadcast %63 : vector<1x1x1xf32> to vector<1x1x3xf32>
    %65 = vector.broadcast %cst_20 : f32 to vector<1x1x3xf32>
    %66 = arith.select %61, %64, %65 : vector<1x1x3xi1>, vector<1x1x3xf32>
    %67 = arith.addf %45, %66 : vector<1x1x3xf32>
    %c0_21 = arith.constant 0 : index
    %c0_22 = arith.constant 0 : index
    %68 = vector.load %arg4[%c0_21, %c0_22] : memref<8x32xf32, #tpu.memory_space<vmem>>, vector<8x32xf32>
    %cst_23 = arith.constant 0.000000e+00 : f32
    %69 = vector.broadcast %cst_23 : f32 to vector<8x32xf32>
    %70 = arith.select %31, %68, %69 : vector<8x32xi1>, vector<8x32xf32>
    %cst_24 = arith.constant dense<0.000000e+00> : vector<8xf32>
    %71 = vector.multi_reduction <add>, %70, %cst_24 [1] : vector<8x32xf32> to vector<8xf32>
    %72 = vector.shape_cast %71 : vector<8xf32> to vector<8x1xf32>
    %cst_25 = arith.constant dense<0.000000e+00> : vector<8xf32>
    %73 = vector.multi_reduction <add>, %68, %cst_25 [1] : vector<8x32xf32> to vector<8xf32>
    %74 = vector.shape_cast %73 : vector<8xf32> to vector<8x1xf32>
    %75 = math.log %74 : vector<8x1xf32>
    %76 = math.log %72 : vector<8x1xf32>
    %77 = arith.subf %75, %76 : vector<8x1xf32>
    %cst_26 = arith.constant 0.000000e+00 : f32
    %78 = vector.broadcast %cst_26 : f32 to vector<8x1xf32>
    %79 = arith.select %29, %77, %78 : vector<8x1xi1>, vector<8x1xf32>
    %cst_27 = arith.constant dense<0.000000e+00> : vector<1xf32>
    %80 = vector.multi_reduction <add>, %79, %cst_27 [0] : vector<8x1xf32> to vector<1xf32>
    %81 = vector.shape_cast %80 : vector<1xf32> to vector<1x1xf32>
    %c1_i32_28 = arith.constant 1 : i32
    %82 = vector.broadcast %c1_i32_28 : i32 to vector<1x1x3xi32>
    %83 = arith.cmpi eq, %44, %82 : vector<1x1x3xi32>
    %84 = vector.shape_cast %81 : vector<1x1xf32> to vector<1x1x1xf32>
    %cst_29 = arith.constant 0.000000e+00 : f32
    %85 = vector.shape_cast %84 : vector<1x1x1xf32> to vector<1x1x1xf32>
    %86 = vector.broadcast %85 : vector<1x1x1xf32> to vector<1x1x3xf32>
    %87 = vector.broadcast %cst_29 : f32 to vector<1x1x3xf32>
    %88 = arith.select %83, %86, %87 : vector<1x1x3xi1>, vector<1x1x3xf32>
    %89 = arith.addf %67, %88 : vector<1x1x3xf32>
    %c0_30 = arith.constant 0 : index
    %c0_31 = arith.constant 0 : index
    %90 = vector.load %arg5[%c0_30, %c0_31] : memref<8x32xf32, #tpu.memory_space<vmem>>, vector<8x32xf32>
    %cst_32 = arith.constant 0.000000e+00 : f32
    %91 = vector.broadcast %cst_32 : f32 to vector<8x32xf32>
    %92 = arith.select %31, %90, %91 : vector<8x32xi1>, vector<8x32xf32>
    %cst_33 = arith.constant dense<0.000000e+00> : vector<8xf32>
    %93 = vector.multi_reduction <add>, %92, %cst_33 [1] : vector<8x32xf32> to vector<8xf32>
    %94 = vector.shape_cast %93 : vector<8xf32> to vector<8x1xf32>
    %cst_34 = arith.constant dense<0.000000e+00> : vector<8xf32>
    %95 = vector.multi_reduction <add>, %90, %cst_34 [1] : vector<8x32xf32> to vector<8xf32>
    %96 = vector.shape_cast %95 : vector<8xf32> to vector<8x1xf32>
    %97 = math.log %96 : vector<8x1xf32>
    %98 = math.log %94 : vector<8x1xf32>
    %99 = arith.subf %97, %98 : vector<8x1xf32>
    %cst_35 = arith.constant 0.000000e+00 : f32
    %100 = vector.broadcast %cst_35 : f32 to vector<8x1xf32>
    %101 = arith.select %29, %99, %100 : vector<8x1xi1>, vector<8x1xf32>
    %cst_36 = arith.constant dense<0.000000e+00> : vector<1xf32>
    %102 = vector.multi_reduction <add>, %101, %cst_36 [0] : vector<8x1xf32> to vector<1xf32>
    %103 = vector.shape_cast %102 : vector<1xf32> to vector<1x1xf32>
    %c2_i32 = arith.constant 2 : i32
    %104 = vector.broadcast %c2_i32 : i32 to vector<1x1x3xi32>
    %105 = arith.cmpi eq, %44, %104 : vector<1x1x3xi32>
    %106 = vector.shape_cast %103 : vector<1x1xf32> to vector<1x1x1xf32>
    %cst_37 = arith.constant 0.000000e+00 : f32
    %107 = vector.shape_cast %106 : vector<1x1x1xf32> to vector<1x1x1xf32>
    %108 = vector.broadcast %107 : vector<1x1x1xf32> to vector<1x1x3xf32>
    %109 = vector.broadcast %cst_37 : f32 to vector<1x1x3xf32>
    %110 = arith.select %105, %108, %109 : vector<1x1x3xi1>, vector<1x1x3xf32>
    %111 = arith.addf %89, %110 : vector<1x1x3xf32>
    %c0_38 = arith.constant 0 : index
    %c0_39 = arith.constant 0 : index
    %c0_40 = arith.constant 0 : index
    %112 = vector.load %arg6[%c0_38, %c0_39, %c0_40] : memref<1x1x3xf32, #tpu.memory_space<vmem>>, vector<1x1x3xf32>
    tpu.vector_store %arg6[%c0_38, %c0_39, %c0_40], %111 {strides = array<i32>} : memref<1x1x3xf32, #tpu.memory_space<vmem>>, vector<1x1x3xf32>,
    return
  }
  func.func @transform_0(%arg0: i32) -> (i32, i32) {
    %c0_i32 = arith.constant 0 : i32
    %c0_i32_0 = arith.constant 0 : i32
    return %arg0, %c0_i32 : i32, i32
  }
  func.func @transform_1(%arg0: i32) -> (i32, i32) {
    %c0_i32 = arith.constant 0 : i32
    %c0_i32_0 = arith.constant 0 : i32
    return %arg0, %c0_i32 : i32, i32
  }
  func.func @transform_2(%arg0: i32) -> (i32, i32) {
    %c0_i32 = arith.constant 0 : i32
    %c0_i32_0 = arith.constant 0 : i32
    return %arg0, %c0_i32 : i32, i32
  }
  func.func @transform_3(%arg0: i32) -> (i32, i32) {
    %c0_i32 = arith.constant 0 : i32
    %c0_i32_0 = arith.constant 0 : i32
    return %arg0, %c0_i32 : i32, i32
  }
  func.func @transform_4(%arg0: i32) -> (i32, i32) {
    %c0_i32 = arith.constant 0 : i32
    %c0_i32_0 = arith.constant 0 : i32
    return %arg0, %c0_i32 : i32, i32
  }
  func.func @transform_5(%arg0: i32) -> (i32, i32, i32) {
    %c0_i32 = arith.constant 0 : i32
    %c0_i32_0 = arith.constant 0 : i32
    %c0_i32_1 = arith.constant 0 : i32
    return %arg0, %c0_i32, %c0_i32_0 : i32, i32, i32
  }
  func.func @transform_6(%arg0: i32) -> (i32, i32, i32) {
    %c0_i32 = arith.constant 0 : i32
    %c0_i32_0 = arith.constant 0 : i32
    %c0_i32_1 = arith.constant 0 : i32
    return %arg0, %c0_i32, %c0_i32_0 : i32, i32, i32
  }
}

</mosaic_0001>

<bundles_post_ra>
// kernel: tpu_custom_call.1
= control target key start
LH: loop header
LB: loop body
LE: loop exit
PB: predicated region body
PF: predicated region fallthrough
CT: control target
= control target key end

     0   :  { %12 = vsyncpa [#allocation3], 0  ;;  %s1021_s0 = inlined_call_operand.vmem [shape: s32[16,1], index: 0, kind: input, shape index: {}]   ;;  %s1022_s1 = inlined_call_operand.vmem [shape: s32[16,1], index: 1, kind: input, shape index: {}]   ;;  %s1023_s2 = inlined_call_operand.vmem [shape: f32[16,32], index: 2, kind: input, shape index: {}]   ;;  %s1024_s3 = inlined_call_operand.vmem [shape: f32[16,32], index: 3, kind: input, shape index: {}]   ;;  %s1025_s4 = inlined_call_operand.vmem [shape: f32[16,32], index: 4, kind: input, shape index: {}]   ;;  %s1026_s5 = inlined_call_operand.hbm [shape: f32[2,1,3], index: 5, kind: output, shape index: {0}]   ;;  %s1027_s6 = inlined_call_operand.hbm [shape: s32[2,1,2], index: 6, kind: output, shape index: {1}]  }
   0x1   :  { %14 = vsyncpa [#allocation3 + $0x1], 0 }
   0x2   :  { %15 = vsyncpa [#allocation5], 0 }
   0x3   :  { %17 = vsyncpa [#allocation5 + $0x1], 0  ;;  %s832_s21 = smov 0   ;;  %s834_s22 = smov 0  }
   0x4   :  { %s836_s23 = smov 0   ;;  %s838_s24 = smov 0  }
   0x5 LB: > { %s853_s25 = sadd.s32 4294967295, %s792_s24   ;;  %s625_s26 = sadd.s32 4294967294, %s792_s24   ;;  %s792_s24 = sphi %s838_s24, %s1037_s24   ;;  %s788_s23 = sphi %s836_s23, %s1036_s23   ;;  %s784_s22 = sphi %s834_s22, %s1035_s22   ;;  %s780_s21 = sphi %s832_s21, %s1034_s21  }
   0x6   : > { %s857_s27 = sadd.s32 1, %s792_s24   ;;  %s160_s28 = sadd.s32 1, %s788_s23 }
   0x7   : > { %s157_s29 = ssub.s32 %s792_s24, %s857_s27  ;;  %p170_p0 = scmp.ne.s32.totalorder %s788_s23, %s784_s22 }
   0x8   : > { %p158_p1 = scmp.eq.s32.totalorder %s157_s29, 0  ;;  %p171_p2 = scmp.eq.s32.totalorder %s853_s25, 1 }
   0x9   : > { %p176_p3 = scmp.ne.s32.totalorder %s784_s22, %s780_s21  ;;  %p177_p4 = scmp.eq.s32.totalorder %s625_s26, 1 }
   0xa   : > { %s868_s30 = scalar_select %p158_p1, %s788_s23, %s160_s28  }
   0xb   : > { %p870_p5 = por %p171_p2, %p170_p0  ;;  %p874_p6 = por %p177_p4, %p176_p3 }
   0xc   : > { %p628_p7 = scmp.ge.s32.totalorder %s792_s24, 1  ;;  %p256_p8 = scmp.lt.s32.totalorder %s792_s24, 3 }
   0xe   : > { %p257_p9 = pnand %p628_p7, %p256_p8 }
   0xf   : > { %p304_p10 = scmp.lt.s32.totalorder (!%p257_p9), %s853_s25, 1  ;;  %v794_v0 = vmov (!%p257_p9), 0   ;;  %vm378_vm0 = vcmask (!%p257_p9), 261120   ;;  %v324_v5 = vlaneseq (!%p257_p9)  ;;  %s634_s12 = sshll.u32 (!%p257_p9), %s853_s25, 3  ;;  %vm340_vm6 = vcmask (!%p257_p9), 7168  }
  0x10   : > { %260 = sbr.rel (%p257_p9) target bundleno = 487 (0x1e7), region = 40  ;;  %684 = vset.pattern.permute.xlu0 (!%p257_p9), %v794_v0  ;;  %685 = vset.pattern.permute.xlu1 (!%p257_p9), %v794_v0  ;;  %v327_v16 = vstv (!%p257_p9), %s634_s12  ;;  %vm374_vm11 = vcmask (!%p257_p9), 8192   ;;  %s635_s14 = sshll.u32 (!%p257_p9), %s853_s25, 4 }
  0x11   : > { %v892_v6 = vand.u32 (!%p257_p9), 127, %v324_v5  ;;  %v325_v14 = vshrl.u32 (!%p257_p9), %v324_v5, 7  ;;  %s947_s17 = scalar_lea.hbm (!%p257_p9), %s1027_s6, %s635_s14  ;;  %s795_s26 = smov (!%p257_p9), [#allocation4]  }
  0x13   : > { %v328_v19 = vadd.s32 (!%p257_p9), %v327_v16, %v325_v14  ;;  %vm348_vm9 = vcmp.eq.s32.totalorder (!%p257_p9), %v892_v6, 0  ;;  %vm368_vm10 = vcmp.eq.s32.totalorder (!%p257_p9), %v892_v6, 1 }
  0x15   : > { %vm329_vm3 = vcmp.lt.s32.totalorder (!%p257_p9), %v328_v19, 16 }
  0x17   : > { %s305_s9 = scalar_select %p304_p10, %s853_s25, 1 }
  0x19   : > { %s629_s10 = sshll.u32 %s305_s9, 3 }
  0x1a   : > { %s307_s13 = scalar_lea.vmem %s1021_s0, %s629_s10  ;;  %s311_s16 = scalar_lea.vmem %s1022_s1, %s629_s10 }
  0x1b   : > { %v332_v1 = vld [vmem:[%s307_s13] sm:$0xff]  ;;  %s315_s19 = scalar_lea.vmem %s1023_s2, %s629_s10  ;;  %s319_s28 = scalar_lea.vmem %s1024_s3, %s629_s10 }
  0x1c   : > { %336 = vperm.xlu0 %684, %v332_v1   ;;  %v376_v2 = vld [vmem:[%s315_s19] sm:$0xff]  ;;  %s323_s11 = scalar_lea.vmem %s1025_s4, %s629_s10  ;;  %vm333_vm4 = vcmp.ne.s32.totalorder %v332_v1, 4294967295  ;;  %s938_s10 = sand.u32 1, %s784_s22  }
  0x1d   : > { %v353_v3 = vld [vmem:[%s311_s16] sm:$0xff]  ;;  %v382_v4 = vsel %vm378_vm0, %v376_v2, 0.0  ;;  %vm908_vm5 = vmand %vm329_vm3, %vm333_vm4  ;;  %s303_s13 = scalar_lea.vmem [#allocation4], %s938_s10  ;;  %s469_s19 = scalar_lea.sflag [#allocation5], %s938_s10 }
  0x1e   : > { %383 = vadd.xlane.f32.xlu1 %v382_v4  ;;  %v405_v9 = vld [vmem:[%s319_s28] sm:$0xff]  ;;  %v339_v23 = vsel %vm908_vm5, 1, %v794_v0  ;;  %vm354_vm7 = vcmp.ne.s32.totalorder %v353_v3, 4294967295  ;;  %s494_s18 = sshll.u32 %s303_s13, 4  ;;  %s702_s28 = sshll.u32 %s795_s26, 4  ;;  %s495_s18 = int_to_ptr.vmem [resolvable:$true] %s494_s18  ;;  %s703_s28 = int_to_ptr.vmem [resolvable:$false] %s702_s28 }
  0x1f   : > { %v410_v12 = vsel %vm378_vm0, %v405_v9, 0.0  ;;  %v433_v13 = vld [vmem:[%s323_s11] sm:$0xff]  ;;  %v341_v24 = vsel %vm340_vm6, %v339_v23, 0  ;;  %vm915_vm8 = vmand %vm329_vm3, %vm354_vm7  ;;  %s698_s20 = scalar_lea.vmem %s495_s18, 16  ;;  %s704_s29 = scalar_lea.vmem %s703_s28, 32 }
  0x20   : > { %357 = vperm.xlu0 %684, %v353_v3   ;;  %v438_v21 = vsel %vm378_vm0, %v433_v13, 0.0  ;;  %v342_v26 = vrot.slane %v341_v24, 4  ;;  %v360_v27 = vsel %vm915_vm8, 1, %v794_v0  ;;  %p699_p11 = scmp.ne.s32.totalorder %s495_s18, %s698_s20  ;;  %p705_p0 = scmp.lt.s32.totalorder %s495_s18, %s703_s28 }
  0x21   : > { %v361_v29 = vsel %vm340_vm6, %v360_v27, 0  ;;  %p706_p1 = scmp.lt.s32.totalorder %s704_s29, %s698_s20 }
  0x22   : > { %v343_v28 = vadd.s32 %v342_v26, %v341_v24  ;;  %v362_v31 = vrot.slane %v361_v29, 4  ;;  %p700_p12 = pnand %p699_p11, %p870_p5 }
  0x23   : > { %p707_p2 = por %p706_p1, %p705_p0 }
  0x24   : > { %v344_v30 = vrot.slane %v343_v28, 2  ;;  %v363_v33 = vadd.s32 %v362_v31, %v361_v29  ;;  %p701_p13 = pneg %p700_p12 }
  0x26   : > { %v345_v32 = vadd.s32 %v344_v30, %v343_v28  ;;  %v364_v35 = vrot.slane %v363_v33, 2  ;;  %p708_p3 = pnand %p707_p2, %p701_p13 }
  0x28   : > { %v346_v34 = vrot.slane %v345_v32, 1  ;;  %v365_v37 = vadd.s32 %v364_v35, %v363_v33 }
  0x2a   : > { %v347_v36 = vadd.s32 %v346_v34, %v345_v32  ;;  %v366_v38 = vrot.slane %v365_v37, 1 }
  0x2c   : > { %v367_v39 = vadd.s32 %v366_v38, %v365_v37 }
  0x9b   : > { %v337_v7 = vpop.permute.xlu0 %336 }
  0x9c   : > { %vm338_vm1 = vcmp.eq.s32.totalorder %v892_v6, %v337_v7 }
  0x9d   : > { %v377_v8 = vsel %vm338_vm1, %v376_v2, 0.0 }
  0x9e   : > { %v379_v10 = vsel %vm378_vm0, %v377_v8, 0.0 }
  0x9f   : > { %380 = vadd.xlane.f32.xlu1 %v379_v10  ;;  %v358_v11 = vpop.permute.xlu0 %357 }
  0xa0   : > { %vm359_vm2 = vcmp.eq.s32.totalorder %v892_v6, %v358_v11 }
  0xa1   : > { %v406_v15 = vsel %vm359_vm2, %v405_v9, 0.0  ;;  %v434_v18 = vsel %vm359_vm2, %v433_v13, 0.0 }
  0xa2   : > { %v407_v17 = vsel %vm378_vm0, %v406_v15, 0.0  ;;  %v435_v20 = vsel %vm378_vm0, %v434_v18, 0.0 }
  0xa3   : > { %411 = vadd.xlane.f32.xlu1 %v410_v12  ;;  %408 = vadd.xlane.f32.xlu0 %v407_v17 }
  0xa7   : > { %436 = vadd.xlane.f32.xlu1 %v435_v20 }
  0xab   : > { %439 = vadd.xlane.f32.xlu1 %v438_v21  ;;  %v384_v40 = vpop.xlane.xlu1 %383 }
  0xac   : > { %686 = vlog2.f32 %v384_v40 }
  0xb6   : > { %v687_v45 = vpop.eup %686 }
  0xb7   : > { %v386_v47 = vmul.f32 0.6931472, %v687_v45 }
  0xbc   : > { %350 = vperm.xlu1 %685, %v347_v36  }
  0xc0   : > { %370 = vperm.xlu1 %685, %v367_v39  }
 0x12c   : > { %v381_v41 = vpop.xlane.xlu1 %380 }
 0x12d   : > { %688 = vlog2.f32 %v381_v41 }
 0x130   : > { %v412_v42 = vpop.xlane.xlu1 %411  ;;  %v409_v43 = vpop.xlane.xlu0 %408 }
 0x131   : > { %690 = vlog2.f32 %v412_v42 }
 0x132   : > { %692 = vlog2.f32 %v409_v43 }
 0x134   : > { %v437_v44 = vpop.xlane.xlu1 %436 }
 0x135   : > { %694 = vlog2.f32 %v437_v44 }
 0x137   : > { %v689_v46 = vpop.eup %688 }
 0x138   : > { %v388_v48 = vmul.f32 0.6931472, %v689_v46  ;;  %v440_v49 = vpop.xlane.xlu1 %439 }
 0x139   : > { %696 = vlog2.f32 %v440_v49 }
 0x13a   : > { %v389_v50 = vsub.f32 %v386_v47, %v388_v48 }
 0x13b   : > { %v691_v51 = vpop.eup %690 }
 0x13c   : > { %v693_v52 = vpop.eup %692  ;;  %v390_v53 = vsel %vm908_vm5, %v389_v50, 0.0  ;;  %v414_v54 = vmul.f32 0.6931472, %v691_v51  ;;  %v351_v9 = vpop.permute.xlu1 %350 }
 0x13d   : > { %v391_v55 = vsel %vm340_vm6, %v390_v53, 0.0  ;;  %v416_v56 = vmul.f32 0.6931472, %v693_v52  ;;  %v352_v15 = vsel %vm348_vm9, %v351_v9, 0 }
 0x13e   : > { %v392_v57 = vrot.slane %v391_v55, 4 }
 0x13f   : > { %v417_v58 = vsub.f32 %v414_v54, %v416_v56  ;;  %v695_v60 = vpop.eup %694 }
 0x140   : > { %v393_v59 = vadd.f32 %v392_v57, %v391_v55  ;;  %v444_v2 = vmul.f32 0.6931472, %v695_v60  ;;  %v371_v17 = vpop.permute.xlu1 %370 }
 0x141   : > { %v418_v61 = vsel %vm915_vm8, %v417_v58, 0.0  ;;  %v372_v19 = vsel %vm368_vm10, %v371_v17, 0 }
 0x142   : > { %v419_v62 = vsel %vm340_vm6, %v418_v61, 0.0  ;;  %v394_v63 = vrot.slane %v393_v59, 2  ;;  %v373_v21 = vadd.s32 %v372_v19, %v352_v15 }
 0x143   : > { %v697_v0 = vpop.eup %696  ;;  %v420_v1 = vrot.slane %v419_v62, 4 }
 0x144   : > { %v442_v3 = vmul.f32 0.6931472, %v697_v0  ;;  %v395_v4 = vadd.f32 %v394_v63, %v393_v59  ;;  %375 = vst.msk [vmem:[%s303_s13] sm:$0x1] %vm374_vm11, %v373_v21 }
 0x145   : > { %v421_v5 = vadd.f32 %v420_v1, %v419_v62 }
 0x146   : > { %v445_v7 = vsub.f32 %v442_v3, %v444_v2  ;;  %v396_v8 = vrot.slane %v395_v4, 1 }
 0x147   : > { %v422_v10 = vrot.slane %v421_v5, 2 }
 0x148   : > { %v446_v11 = vsel %vm915_vm8, %v445_v7, 0.0  ;;  %v397_v12 = vadd.f32 %v396_v8, %v395_v4 }
 0x149   : > { %v447_v13 = vsel %vm340_vm6, %v446_v11, 0.0  ;;  %v423_v14 = vadd.f32 %v422_v10, %v421_v5 }
 0x14a   : > { %v448_v16 = vrot.slane %v447_v13, 4  ;;  %400 = vperm.xlu0 %684, %v397_v12  }
 0x14b   : > { %v424_v18 = vrot.slane %v423_v14, 1 }
 0x14c   : > { %v449_v20 = vadd.f32 %v448_v16, %v447_v13 }
 0x14d   : > { %v425_v22 = vadd.f32 %v424_v18, %v423_v14 }
 0x14e   : > { %v450_v23 = vrot.slane %v449_v20, 2 }
 0x14f   : > { %428 = vperm.xlu1 %685, %v425_v22  }
 0x150   : > { %v451_v24 = vadd.f32 %v450_v23, %v449_v20 }
 0x152   : > { %v452_v25 = vrot.slane %v451_v24, 1 }
 0x154   : > { %v453_v26 = vadd.f32 %v452_v25, %v451_v24 }
 0x156   : > { %457 = vperm.xlu1 %685, %v453_v26  }
 0x157   : > { %711 = shalt.err (!%p708_p3)
}
 0x158   : > { %s712_s9 = scalar_lea.hbm %s947_s17, 16  ;;  %s716_s13 = scalar_lea.hbm %s1027_s6, 32 }
 0x159   : > { %p713_p4 = scmp.ne.s32.totalorder %s947_s17, %s712_s9  ;;  %p717_p9 = scmp.lt.u32.totalorder %s947_s17, %s1027_s6 }
 0x15a   : > { %p718_p10 = scmp.lt.u32.totalorder %s716_s13, %s712_s9  ;;  %p720_p12 = scmp.lt.u32.totalorder %s712_s9, %s947_s17 }
 0x15b   : > { %p714_p7 = pnand %p713_p4, %p870_p5 }
 0x15c   : > { %p719_p11 = por %p718_p10, %p717_p9 }
 0x15d   : > { %p715_p8 = pneg %p714_p7 }
 0x15e   : > { %p721_p13 = por %p720_p12, %p719_p11 }
 0x160   : > { %p722_p0 = pnand %p721_p13, %p715_p8 }
 0x162   : > { %725 = shalt.err (!%p722_p0)
}
 0x163   : > { %640 = dma.vmem_to_hbm [thread:$0]  (%p870_p5), %s495_s18, 16, %s947_s17, %s469_s19   ;;  %vm454_vm12 = vcmp.eq.s32.totalorder %v892_v6, 2  ;;  %vm462_vm13 = vcmask 16384  }
 0x164   : > { %s297_s20 = scalar_lea.vmem [#allocation2], %s938_s10  ;;  %s978_s19 = scalar_lea.hbm %s1026_s5, %s635_s14 }
 0x165   : > { %s481_s26 = sshll.u32 %s297_s20, 4  ;;  %s465_s28 = scalar_lea.sflag [#allocation3], %s938_s10  ;;  %s980_s26 = int_to_ptr.vmem [resolvable:$true] %s481_s26 }
 0x166   : > { %s726_s29 = scalar_lea.vmem %s980_s26, 16  ;;  %s796_s9 = smov [#allocation2]  }
 0x167   : > { %p727_p1 = scmp.ne.s32.totalorder %s980_s26, %s726_s29  ;;  %s730_s11 = sshll.u32 %s796_s9, 4  ;;  %s731_s11 = int_to_ptr.vmem [resolvable:$false] %s730_s11 }
 0x168   : > { %s732_s25 = scalar_lea.vmem %s731_s11, 32  ;;  %p733_p4 = scmp.lt.s32.totalorder %s980_s26, %s731_s11 }
 0x169   : > { %p728_p2 = pnand %p727_p1, %p870_p5  ;;  %p734_p7 = scmp.lt.s32.totalorder %s732_s25, %s726_s29 }
 0x16b   : > { %p729_p3 = pneg %p728_p2  ;;  %p735_p8 = por %p734_p7, %p733_p4 }
 0x16d   : > { %p736_p9 = pnand %p735_p8, %p729_p3 }
 0x1c9   : > { %v401_v28 = vpop.permute.xlu0 %400 }
 0x1ca   : > { %v403_v30 = vsel %vm348_vm9, %v401_v28, 0.0 }
 0x1ce   : > { %v429_v27 = vpop.permute.xlu1 %428 }
 0x1cf   : > { %v431_v29 = vsel %vm368_vm10, %v429_v27, 0.0 }
 0x1d0   : > { %v432_v31 = vadd.f32 %v431_v29, %v403_v30 }
 0x1d5   : > { %v458_v32 = vpop.permute.xlu1 %457 }
 0x1d6   : > { %v460_v33 = vsel %vm454_vm12, %v458_v32, 0.0 }
 0x1d7   : > { %v461_v34 = vadd.f32 %v460_v33, %v432_v31 }
 0x1d9   : > { %463 = vst.msk [vmem:[%s297_s20] sm:$0x1] %vm462_vm13, %v461_v34 }
 0x1da   : > { %739 = shalt.err (!%p736_p9)
}
 0x1db   : > { %s740_s10 = scalar_lea.hbm %s978_s19, 16  ;;  %s744_s13 = scalar_lea.hbm %s1026_s5, 32 }
 0x1dc   : > { %p741_p10 = scmp.ne.s32.totalorder %s978_s19, %s740_s10  ;;  %p745_p13 = scmp.lt.u32.totalorder %s978_s19, %s1026_s5 }
 0x1dd   : > { %p746_p0 = scmp.lt.u32.totalorder %s744_s13, %s740_s10  ;;  %p748_p2 = scmp.lt.u32.totalorder %s740_s10, %s978_s19 }
 0x1de   : > { %p742_p11 = pnand %p741_p10, %p870_p5 }
 0x1df   : > { %p747_p1 = por %p746_p0, %p745_p13 }
 0x1e0   : > { %p743_p12 = pneg %p742_p11 }
 0x1e1   : > { %p749_p3 = por %p748_p2, %p747_p1 }
 0x1e3   : > { %p750_p4 = pnand %p749_p3, %p743_p12 }
 0x1e5   : > { %753 = shalt.err (!%p750_p4)
}
 0x1e6   : > { %639 = dma.vmem_to_hbm [thread:$0]  (%p870_p5), %s980_s26, 16, %s978_s19, %s465_s28  }
 0x1e7 PF: > { %p650_p7 = scmp.ge.s32.totalorder %s792_s24, 2  ;;  %s506_s20 = sand.u32 1, %s780_s21  }
 0x1e8   : > { %s507_s17 = scalar_lea.sflag [#allocation3], %s506_s20 }
 0x1e9   : > { %p644_p8 = pnand %p650_p7, %p874_p6 }
 0x1eb   : > { %771 = dma.done.wait (!%p644_p8), %s507_s17, 16  }
 0x1ec   : > { %773 = vsyncadd (!%p644_p8), %s507_s17, 4294967280  ;;  %s515_s18 = scalar_lea.sflag [#allocation5], %s506_s20 }
 0x1ed   : > { %775 = dma.done.wait (!%p644_p8), %s515_s18, 16  }
 0x1ee   : > { %777 = vsyncadd (!%p644_p8), %s515_s18, 4294967280  ;;  %p20_p5 = scmp.ge.s32.totalorder %s857_s27, 4   ;;  %s1034_s21 = smov %s784_s22 }
 0x1ef   : > { %s1035_s22 = smov %s788_s23  ;;  %s1036_s23 = smov %s868_s30 }
 0x1f0   : > { %s1037_s24 = smov %s857_s27  ;;  %22 = sbr.rel (!%p20_p5) target bundleno = 5 (0x5), region = 104 }
 0x1f7   :  { %519 = vsyncpa [#allocation3], 1 }
 0x1f8   :  { %521 = vsyncpa [#allocation3 + $0x1], 1 }
 0x1f9   :  { %522 = vsyncpa [#allocation5], 1 }
 0x1fa   :  { %524 = vsyncpa [#allocation5 + $0x1], 1 }

</bundles_post_ra>
